<compile_context>
chip_gen: v6e
topology: v6e:2x2x1
jax: 0.10.0
libtpu: 0.0.40
codegen_flags: <defaults>
</compile_context>

<pallas_src>
import functools
import math

import jax
import jax.numpy as jnp
from jax.experimental import pallas as pl
from jax.experimental.pallas import tpu as pltpu


def _vmem_config():
    """Return (scoped vmem limit, per-grid-step working-set budget) in bytes."""
    limit, budget = 32 << 20, 12 << 20            # safe defaults (fit v7x's 64 MiB)
    try:
        cap = getattr(pltpu.get_tpu_info(), "vmem_capacity_bytes", None)
        if cap:
            limit = min(max(cap // 2, 16 << 20), 64 << 20)  # 64 MiB v5e/v6e, 32 MiB v7x
            budget = max(8 << 20, limit // 2)
    except Exception:
        pass
    return limit, budget


def _round_down(v, m):
    return (v // m) * m


# ----------------------------- 'add' kernel ---------------------------------
def _add_kernel(*refs):
    *in_refs, o_ref = refs
    # f32 accumulation for float inputs (free — kernel is memory-bound); matches
    # PyTorch pairwise-add to within one rounding for 2 inputs, more accurate for >2.
    acc_dtype = jnp.float32 if jnp.issubdtype(o_ref.dtype, jnp.floating) else o_ref.dtype
    acc = in_refs[0][...].astype(acc_dtype)
    for r in in_refs[1:]:
        acc = acc + r[...].astype(acc_dtype)
    o_ref[...] = acc.astype(o_ref.dtype)


def _pick_lanes(total, pack):
    """Pick a lane width (multiple of 128) and how much flat zero-padding is needed."""
    for lanes in (2048, 1024, 512, 256, 128):
        if total % lanes == 0 and total // lanes >= pack:
            return lanes, 0
    for lanes in (2048, 1024, 512, 256, 128):
        if total % lanes == 0:
            return lanes, 0
    # Nothing divides: pad the flat view so stores stay lane-dense and unmasked.
    lanes = 512 if total >= 512 * pack else 128
    return lanes, (-total) % lanes


def _merge_add(xs, vmem_limit, vmem_budget):
    shape, dtype = xs[0].shape, xs[0].dtype
    for x in xs:
        assert x.shape == shape, "'add' mode requires identical shapes"
        assert x.dtype == dtype, "'add' mode requires identical dtypes"
    itemsize = jnp.dtype(dtype).itemsize
    pack = max(8, 32 // itemsize)          # sublane packing: 8 f32, 16 bf16, 32 int8
    total = math.prod(shape)

    lanes, pad = _pick_lanes(total, pack)
    rows = (total + pad) // lanes
    flats = [x.reshape(-1) for x in xs]
    if pad:
        flats = [jnp.pad(f, (0, pad)) for f in flats]
    xs2 = [f.reshape(rows, lanes) for f in flats]

    # Row-block size: fill the VMEM budget (double-buffered, n inputs + 1 output),
    # round to the dtype's sublane packing, keep >= ~8 grid steps so both v7x
    # TensorCores share the parallel axis, never shrink a block below ~1 MiB.
    n_bufs = len(xs2) + 1
    per_block = max(1, vmem_budget // (2 * n_bufs))
    tm = max(1, min(per_block // (lanes * itemsize), rows))
    if rows >= pack:
        tm = max(pack, _round_down(tm, pack))
        one_mib_rows = max(pack, _round_down((1 << 20) // (lanes * itemsize), pack))
        steps_rows = max(pack, _round_down(pl.cdiv(rows, 8), pack))
        tm = min(tm, max(one_mib_rows, steps_rows))
    else:
        tm = rows                          # block == full dim -> valid shape

    spec = pl.BlockSpec((tm, lanes), lambda i: (i, 0))
    out = pl.pallas_call(
        _add_kernel,
        out_shape=jax.ShapeDtypeStruct((rows, lanes), dtype),
        grid=(pl.cdiv(rows, tm),),
        in_specs=[spec] * len(xs2),
        out_specs=spec,
        compiler_params=pltpu.CompilerParams(
            dimension_semantics=("parallel",),
            vmem_limit_bytes=vmem_limit),
    )(*xs2)
    if pad:
        out = out.reshape(-1)[:total]
    return out.reshape(shape)


# ----------------------------- 'cat' kernels ---------------------------------
def _make_lane_cat_kernel(widths):
    def kernel(*refs):
        *in_refs, o_ref = refs
        off = 0
        for r, w in zip(in_refs, widths):
            o_ref[:, :, off:off + w] = r[...]   # lane-axis concat: unmasked vst
            off += w
    return kernel


def _make_sublane_cat_kernel(channels):
    def kernel(*refs):
        *in_refs, o_ref = refs
        off = 0
        for r, c in zip(in_refs, channels):
            o_ref[:, off:off + c, :] = r[...]
            off += c
    return kernel


def _merge_cat(xs, vmem_limit, vmem_budget):
    B, trail, dtype = xs[0].shape[0], xs[0].shape[2:], xs[0].dtype
    for x in xs:
        assert x.shape[0] == B and x.shape[2:] == trail, "'cat' shapes must match off dim 1"
        assert x.dtype == dtype, "'cat' mode requires identical dtypes"
    channels = [int(x.shape[1]) for x in xs]
    c_total = sum(channels)
    hw = math.prod(trail) if trail else 1
    itemsize = jnp.dtype(dtype).itemsize

    # Primary path: concatenate on the LANE axis.  Each input is one contiguous
    # (1, 1, C_i*hw) block copied to lane offset off_i of the (1, 1, C_total*hw)
    # output block -> contiguous DMAs and unmasked lane-dense stores.
    widths = [c * hw for c in channels]
    w_total = c_total * hw
    lane_cat_footprint = 4 * w_total * itemsize        # 2 buffers x (inputs + output)
    if lane_cat_footprint <= vmem_budget:
        xs2 = [x.reshape(B, 1, w) for x, w in zip(xs, widths)]
        in_specs = [pl.BlockSpec((1, 1, w), lambda b: (b, 0, 0)) for w in widths]
        out_spec = pl.BlockSpec((1, 1, w_total), lambda b: (b, 0, 0))
        # TODO(synk): with B == 1 the single-step grid leaves one v7x TensorCore idle;
        # per-input lane offsets cannot be expressed by a shared column grid axis.
        out = pl.pallas_call(
            _make_lane_cat_kernel(widths),
            out_shape=jax.ShapeDtypeStruct((B, 1, w_total), dtype),
            grid=(B,),
            in_specs=in_specs,
            out_specs=out_spec,
            compiler_params=pltpu.CompilerParams(
                dimension_semantics=("parallel",),
                vmem_limit_bytes=vmem_limit),
        )(*xs2)
        return out.reshape((B, c_total) + trail)

    # Fallback (per-batch lane-cat slab too large for the VMEM budget):
    # sublane-axis concat with lane-dense column tiles over H*W.
    # TODO(synk): extreme C_total can still exceed the scoped VMEM limit at col=128;
    # a channel-group grid axis would be needed for that regime.
    xs3 = [x.reshape(B, c, hw) for x, c in zip(xs, channels)]
    max_col = max(1, vmem_budget // (4 * c_total * itemsize))
    if hw % 128 == 0:
        col = min(hw, max(128, _round_down(max_col, 128)))
    else:
        col = hw
    in_specs = [pl.BlockSpec((1, c, col), lambda b, j: (b, 0, j)) for c in channels]
    out_spec = pl.BlockSpec((1, c_total, col), lambda b, j: (b, 0, j))
    out = pl.pallas_call(
        _make_sublane_cat_kernel(channels),
        out_shape=jax.ShapeDtypeStruct((B, c_total, hw), dtype),
        grid=(B, pl.cdiv(hw, col)),
        in_specs=in_specs,
        out_specs=out_spec,
        compiler_params=pltpu.CompilerParams(
            dimension_semantics=("parallel", "parallel"),
            vmem_limit_bytes=vmem_limit),
    )(*xs3)
    return out.reshape((B, c_total) + trail)


# ----------------------------- MergeBlock API --------------------------------
def merge_block(xs, mode: str):
    """Forward pass of MergeBlock: xs is a list/tuple of NCHW arrays."""
    assert mode in ("add", "cat")
    xs = list(xs)
    assert len(xs) >= 1
    if len(xs) == 1:
        return xs[0]
    vmem_limit, vmem_budget = _vmem_config()
    if mode == "add":
        return _merge_add(xs, vmem_limit, vmem_budget)
    return _merge_cat(xs, vmem_limit, vmem_budget)


merge_block_add = functools.partial(merge_block, mode="add")
merge_block_cat = functools.partial(merge_block, mode="cat")


if __name__ == "__main__":
    key = jax.random.PRNGKey(0)
    k1, k2, k3 = jax.random.split(key, 3)

    # 'add' mode: two identically-shaped inputs.
    a = jax.random.normal(k1, (2, 4, 16, 16), dtype=jnp.float32)
    b = jax.random.normal(k2, (2, 4, 16, 16), dtype=jnp.float32)
    out_add = jax.block_until_ready(merge_block_add([a, b]))
    assert out_add.shape == (2, 4, 16, 16)
    assert jnp.allclose(out_add, a + b, atol=1e-6), "add mode mismatch"

    # 'add' mode: three inputs (n-ary path).
    out_add3 = jax.block_until_ready(merge_block_add([a, b, a]))
    assert jnp.allclose(out_add3, a + b + a, atol=1e-6), "3-way add mismatch"

    # 'add' mode: bf16 + awkward shape (exercises the padded lane-dense fallback
    # and the dtype-aware sublane packing).
    a2 = jax.random.normal(k1, (3, 3, 5, 7), dtype=jnp.float32).astype(jnp.bfloat16)
    b2 = jax.random.normal(k2, (3, 3, 5, 7), dtype=jnp.float32).astype(jnp.bfloat16)
    out_add_b = jax.block_until_ready(merge_block_add([a2, b2]))
    ref_b = a2.astype(jnp.float32) + b2.astype(jnp.float32)
    assert out_add_b.shape == (3, 3, 5, 7)
    assert jnp.allclose(out_add_b.astype(jnp.float32), ref_b, atol=1e-2, rtol=1e-2), \
        "bf16 padded add mismatch"

    # 'cat' mode: differing channel counts, concatenated on dim 1 (lane-axis path).
    c = jax.random.normal(k3, (2, 8, 16, 16), dtype=jnp.float32)
    out_cat = jax.block_until_ready(merge_block_cat([a, c]))
    ref_cat = jnp.concatenate([a, c], axis=1)
    assert out_cat.shape == (2, 12, 16, 16)
    assert jnp.array_equal(out_cat, ref_cat), "cat mode mismatch"

    print("KERNEL_OK")
</pallas_src>

<mosaic_0001>
module attributes {stable_mosaic.version = 11 : i64} {
  func.func @_add_kernel(%arg0: i32, %arg1: memref<8x256xf32, #tpu.memory_space<vmem>>, %arg2: memref<8x256xf32, #tpu.memory_space<vmem>>, %arg3: memref<8x256xf32, #tpu.memory_space<vmem>>) attributes {dimension_semantics = [#tpu.dimension_semantics<parallel>], iteration_bounds = array<i64: 1>, scalar_prefetch = 0 : i64, scratch_operands = 0 : i64, tpu.core_type = #tpu.core_type<tc>, window_params = [{transform_indices = @transform_0, window_bounds = array<i64: 8, 256>}, {transform_indices = @transform_1, window_bounds = array<i64: 8, 256>}, {transform_indices = @transform_2, window_bounds = array<i64: 8, 256>}]} {
    %c0 = arith.constant 0 : index
    %c0_0 = arith.constant 0 : index
    %0 = vector.load %arg1[%c0, %c0_0] : memref<8x256xf32, #tpu.memory_space<vmem>>, vector<8x256xf32>
    %c0_1 = arith.constant 0 : index
    %c0_2 = arith.constant 0 : index
    %1 = vector.load %arg2[%c0_1, %c0_2] : memref<8x256xf32, #tpu.memory_space<vmem>>, vector<8x256xf32>
    %2 = arith.addf %0, %1 : vector<8x256xf32>
    %c0_3 = arith.constant 0 : index
    %c0_4 = arith.constant 0 : index
    %3 = vector.load %arg3[%c0_3, %c0_4] : memref<8x256xf32, #tpu.memory_space<vmem>>, vector<8x256xf32>
    tpu.vector_store %arg3[%c0_3, %c0_4], %2 {strides = array<i32>} : memref<8x256xf32, #tpu.memory_space<vmem>>, vector<8x256xf32>,
    return
  }
  func.func @transform_0(%arg0: i32) -> (i32, i32) {
    %c0_i32 = arith.constant 0 : i32
    %c0_i32_0 = arith.constant 0 : i32
    return %arg0, %c0_i32 : i32, i32
  }
  func.func @transform_1(%arg0: i32) -> (i32, i32) {
    %c0_i32 = arith.constant 0 : i32
    %c0_i32_0 = arith.constant 0 : i32
    return %arg0, %c0_i32 : i32, i32
  }
  func.func @transform_2(%arg0: i32) -> (i32, i32) {
    %c0_i32 = arith.constant 0 : i32
    %c0_i32_0 = arith.constant 0 : i32
    return %arg0, %c0_i32 : i32, i32
  }
}

</mosaic_0001>

<bundles_post_ra>
// kernel: tpu_custom_call.1
= control target key start
LH: loop header
LB: loop body
LE: loop exit
PB: predicated region body
PF: predicated region fallthrough
CT: control target
= control target key end

     0   :  { %7 = vsyncpa [#allocation3], 0  ;;  %s156_s0 = inlined_call_operand.hbm [shape: f32[8,256], index: 0, kind: input, shape index: {}]   ;;  %s157_s1 = inlined_call_operand.hbm [shape: f32[8,256], index: 1, kind: input, shape index: {}]   ;;  %s158_s2 = inlined_call_operand.hbm [shape: f32[8,256], index: 2, kind: output, shape index: {}]  }
   0x1   :  { %8 = vsyncpa [#allocation6], 0 }
   0x2   :  { %9 = vsyncpa [#allocation4], 0  ;;  %s129_s9 = smov [#allocation2]   ;;  %s130_s11 = smov [#allocation5]  }
   0x3   :  { %s16_s10 = sshll.u32 %s129_s9, 4  ;;  %s26_s12 = sshll.u32 %s130_s11, 4  ;;  %s17_s10 = int_to_ptr.vmem [resolvable:$true] %s16_s10  ;;  %s27_s12 = int_to_ptr.vmem [resolvable:$true] %s26_s12 }
   0x4   :  { %s71_s13 = scalar_lea.vmem %s17_s10, 256  ;;  %p76_p1 = scmp.lt.s32.totalorder %s17_s10, %s17_s10 }
   0x5   :  { %p72_p0 = scmp.ne.s32.totalorder %s17_s10, %s71_s13  ;;  %p77_p2 = scmp.lt.s32.totalorder %s71_s13, %s71_s13 }
   0x7   :  { %p78_p3 = por %p77_p2, %p76_p1 }
   0x9   :  { %p79_p4 = pnand %p78_p3, %p72_p0 }
   0xb   :  { %82 = shalt.err (!%p79_p4)
}
   0xc   :  { %19 = dma.hbm_to_vmem [thread:$0]  %s156_s0, 256, %s17_s10, [#allocation3]  }
   0xd   :  { %s91_s16 = scalar_lea.vmem %s27_s12, 256  ;;  %p96_p6 = scmp.lt.s32.totalorder %s27_s12, %s27_s12 }
   0xe   :  { %p92_p5 = scmp.ne.s32.totalorder %s27_s12, %s91_s16  ;;  %p97_p7 = scmp.lt.s32.totalorder %s91_s16, %s91_s16 }
  0x10   :  { %p98_p8 = por %p97_p7, %p96_p6 }
  0x12   :  { %p99_p9 = pnand %p98_p8, %p92_p5 }
  0x14   :  { %102 = shalt.err (!%p99_p9)
}
  0x15   :  { %29 = dma.hbm_to_vmem [thread:$0]  %s157_s1, 256, %s27_s12, [#allocation6]  }
  0x16   :  { %123 = dma.done.wait [#allocation3], 256  }
  0x17   :  { %124 = vsyncadd [#allocation3], 4294967040 }
  0x18   :  { %125 = dma.done.wait [#allocation6], 256  }
  0x19   :  { %126 = vsyncadd [#allocation6], 4294967040  ;;  %s131_s19 = smov [#allocation7]   ;;  %v36_v0 = vld [vmem:[#allocation2] sm:$0xff]  ;;  %v38_v1 = vld [vmem:[#allocation5] sm:$0xff] }
  0x1a   :  { %s50_s20 = sshll.u32 %s131_s19, 4  ;;  %v37_v2 = vld [vmem:[#allocation2 + $0x8] sm:$0xff]  ;;  %v40_v3 = vadd.f32 %v38_v1, %v36_v0  ;;  %v39_v4 = vld [vmem:[#allocation5 + $0x8] sm:$0xff]  ;;  %s51_s20 = int_to_ptr.vmem [resolvable:$true] %s50_s20 }
  0x1b   :  { %v41_v5 = vadd.f32 %v39_v4, %v37_v2  ;;  %s103_s0 = scalar_lea.vmem %s51_s20, 256  ;;  %p108_p11 = scmp.lt.s32.totalorder %s51_s20, %s51_s20 }
  0x1c   :  { %42 = vst [vmem:[#allocation7] sm:$0xff] %v40_v3  ;;  %p104_p10 = scmp.ne.s32.totalorder %s51_s20, %s103_s0  ;;  %p109_p12 = scmp.lt.s32.totalorder %s103_s0, %s103_s0 }
  0x1d   :  { %43 = vst [vmem:[#allocation7 + $0x8] sm:$0xff] %v41_v5 }
  0x1e   :  { %p110_p13 = por %p109_p12, %p108_p11 }
  0x20   :  { %p111_p0 = pnand %p110_p13, %p104_p10 }
  0x22   :  { %114 = shalt.err (!%p111_p0)
}
  0x23   :  { %53 = dma.vmem_to_hbm [thread:$0]  %s51_s20, 256, %s158_s2, [#allocation4]  }
  0x24   :  { %127 = dma.done.wait [#allocation4], 256  }
  0x25   :  { %128 = vsyncadd [#allocation4], 4294967040 }
  0x26   :  { %57 = vsyncpa [#allocation3], 1 }
  0x27   :  { %58 = vsyncpa [#allocation6], 1 }
  0x28   :  { %59 = vsyncpa [#allocation4], 1 }

</bundles_post_ra>
